<compile_context>
chip_gen: v6e
topology: v6e:2x2x1
jax: 0.10.0
libtpu: 0.0.40
codegen_flags: <defaults>
</compile_context>

<pallas_src>
import jax
import jax.numpy as jnp
from jax.experimental import pallas as pl
from jax.experimental.pallas import tpu as pltpu

_LANE = 128


def _make_silu_kernel(compute_dtype):
    def kernel(x_ref, o_ref):
        # Elementwise func: x * sigmoid(x) (SiLU) on the VPU/EUP.
        x = x_ref[...].astype(compute_dtype)
        o_ref[...] = (x * jax.nn.sigmoid(x)).astype(o_ref.dtype)
    return kernel


def _silu_jnp(x):
    # Plain-JAX version used only for the <128-element ragged tail.
    xf = x.astype(jnp.float32)
    return (xf * jax.nn.sigmoid(xf)).astype(x.dtype)


def _device_kind():
    try:
        return jax.devices()[0].device_kind.lower()
    except Exception:  # pragma: no cover - defensive only
        return ""


def _pick_layout(total):
    """Lane-dense (rows, cols) flattening of `total` elements (total % 128 == 0).

    Prefers a large cols (multiple of 128) that divides `total` exactly and
    leaves rows >= 8 so vreg sublanes are filled.  No padding is ever needed.
    """
    for cand in (4096, 2048, 1024, 512, 256):
        if total % cand == 0 and total // cand >= 8:
            return total // cand, cand
    return total // _LANE, _LANE


def _cost(total, itemsize):
    # 1 read + 1 write of every element; ~4 VALU ops + 1 transcendental each.
    return pl.CostEstimate(
        flops=4 * total,
        transcendentals=total,
        bytes_accessed=2 * total * itemsize,
    )


def lambda_forward(x, donate=False):
    """Apply the Lambda-wrapped elementwise func (SiLU) via a Pallas TPU kernel."""
    orig_shape = x.shape
    dtype = x.dtype
    total = x.size
    if total == 0:
        return x
    # TODO(synk): integer dtypes would be computed in float and truncated on
    #             the cast back; the Lambda func is assumed to be on floats.
    itemsize = jnp.dtype(dtype).itemsize
    kind = _device_kind()

    # v6e / v7x have bf16 VALU + EUP -> keep bf16 native; otherwise f32.
    if dtype == jnp.bfloat16 and ("v6" in kind or "v7" in kind):
        compute_dtype = jnp.bfloat16
    else:
        compute_dtype = jnp.float32
    kernel = _make_silu_kernel(compute_dtype)

    io_aliases = {0: 0} if donate else {}

    flat = x.reshape(-1)
    main = (total // _LANE) * _LANE      # lane-aligned head
    tail = total - main                  # < 128 ragged elements

    if main == 0:
        # Fewer than 128 elements: one tiny full-array block (a block equal to
        # the full array dims is exempt from the (8,128) divisibility rule).
        out_small = pl.pallas_call(
            kernel,
            out_shape=jax.ShapeDtypeStruct((1, total), dtype),
            in_specs=[pl.BlockSpec(memory_space=pltpu.MemorySpace.VMEM)],
            out_specs=pl.BlockSpec(memory_space=pltpu.MemorySpace.VMEM),
            cost_estimate=_cost(total, itemsize),
            input_output_aliases=io_aliases,
        )(flat.reshape(1, total))
        return out_small.reshape(orig_shape)

    head = flat[:main] if tail else flat
    rows, cols = _pick_layout(main)
    x2d = head.reshape(rows, cols)

    # Sublane granularity: 8 for 32-bit, 16 for 16-bit, 32 for 8-bit packing.
    sub = 8 if itemsize >= 4 else (16 if itemsize == 2 else 32)
    # ~2 MiB tiles by default (v5e/v6e); ~4 MiB on v7x where HBM is ~3.2 TB/s
    # and the ~0.35 us/step pipeline overhead would otherwise be a ~25% tax.
    # Double-buffered in+out stays well under every chip's scoped-VMEM limit.
    max_tile_bytes = (4 << 20) if "v7" in kind else (2 << 20)
    tile_r = max(sub, min(rows, (max_tile_bytes // (cols * itemsize)) // sub * sub))

    if tile_r >= rows:
        # Small input: single full-array block, no grid / per-step overhead.
        out2d = pl.pallas_call(
            kernel,
            out_shape=jax.ShapeDtypeStruct((rows, cols), dtype),
            in_specs=[pl.BlockSpec(memory_space=pltpu.MemorySpace.VMEM)],
            out_specs=pl.BlockSpec(memory_space=pltpu.MemorySpace.VMEM),
            cost_estimate=_cost(main, itemsize),
            compiler_params=pltpu.CompilerParams(
                allow_input_fusion=[True],
            ),
            input_output_aliases=io_aliases,
        )(x2d)
    else:
        # v7x: CORE_PARALLEL actually shards the row loop across its 2 TCs
        # (plain "parallel" is measured near-neutral).  No-op on 1-TC chips.
        dim_sem = (pltpu.CORE_PARALLEL,) if "v7" in kind else ("parallel",)
        grid = (pl.cdiv(rows, tile_r),)      # final partial block is masked
        out2d = pl.pallas_call(
            kernel,
            out_shape=jax.ShapeDtypeStruct((rows, cols), dtype),
            grid=grid,
            in_specs=[pl.BlockSpec((tile_r, cols), lambda i: (i, 0))],
            out_specs=pl.BlockSpec((tile_r, cols), lambda i: (i, 0)),
            cost_estimate=_cost(main, itemsize),
            compiler_params=pltpu.CompilerParams(
                dimension_semantics=dim_sem,
                vmem_limit_bytes=32 << 20,
                allow_input_fusion=[True],
            ),
            input_output_aliases=io_aliases,
        )(x2d)

    out_flat = out2d.reshape(-1)
    if tail:
        # Ragged (<128-element) tail computed in plain jnp and stitched on.
        # TODO(synk): the concatenate costs one extra output write, vs. the old
        #             pad+slice fallback's two extra full HBM round trips.
        out_flat = jnp.concatenate([out_flat, _silu_jnp(flat[main:])])
    return out_flat.reshape(orig_shape)


if __name__ == "__main__":
    key = jax.random.PRNGKey(0)

    # NCHW input, small shapes (batch=2, channels=4, spatial=16x16).
    x = jax.random.normal(key, (2, 4, 16, 16), dtype=jnp.float32)
    y = lambda_forward(x)
    jax.block_until_ready(y)

    y_ref = x * jax.nn.sigmoid(x)
    assert y.shape == x.shape and y.dtype == x.dtype
    assert jnp.allclose(y, y_ref, atol=1e-6, rtol=1e-6)

    # Ragged element count (not a multiple of 128): head via kernel, tail in jnp.
    x2 = jax.random.normal(jax.random.PRNGKey(1), (4, 263), dtype=jnp.float32)
    y2 = lambda_forward(x2)
    jax.block_until_ready(y2)
    y2_ref = x2 * jax.nn.sigmoid(x2)
    assert y2.shape == x2.shape and y2.dtype == x2.dtype
    assert jnp.allclose(y2, y2_ref, atol=1e-6, rtol=1e-6)

    print("KERNEL_OK")
</pallas_src>

<mosaic_0001>
module attributes {stable_mosaic.version = 11 : i64} {
  func.func @kernel(%arg0: memref<8x256xf32, #tpu.memory_space<vmem>>, %arg1: memref<8x256xf32, #tpu.memory_space<vmem>>) attributes {dimension_semantics = [], scalar_prefetch = 0 : i64, scratch_operands = 0 : i64, tpu.core_type = #tpu.core_type<tc>} {
    %c0 = arith.constant 0 : index
    %c0_0 = arith.constant 0 : index
    %0 = vector.load %arg0[%c0, %c0_0] : memref<8x256xf32, #tpu.memory_space<vmem>>, vector<8x256xf32>
    %1 = arith.negf %0 : vector<8x256xf32>
    %2 = math.exp %1 : vector<8x256xf32>
    %cst = arith.constant 1.000000e+00 : f32
    %3 = vector.broadcast %cst : f32 to vector<8x256xf32>
    %4 = arith.addf %3, %2 : vector<8x256xf32>
    %5 = arith.divf %3, %4 : vector<8x256xf32>
    %6 = arith.mulf %0, %5 : vector<8x256xf32>
    %c0_1 = arith.constant 0 : index
    %c0_2 = arith.constant 0 : index
    %7 = vector.load %arg1[%c0_1, %c0_2] : memref<8x256xf32, #tpu.memory_space<vmem>>, vector<8x256xf32>
    tpu.vector_store %arg1[%c0_1, %c0_2], %6 {strides = array<i32>} : memref<8x256xf32, #tpu.memory_space<vmem>>, vector<8x256xf32>,
    return
  }
}

</mosaic_0001>

<bundles_post_ra>
// kernel: tpu_custom_call.1
= control target key start
LH: loop header
LB: loop body
LE: loop exit
PB: predicated region body
PF: predicated region fallthrough
CT: control target
= control target key end

     0   :  { %6 = vsyncpa [#allocation3], 0  ;;  %s128_s0 = inlined_call_operand.hbm [shape: f32[8,256], index: 0, kind: input, shape index: {}]   ;;  %s129_s1 = inlined_call_operand.hbm [shape: f32[8,256], index: 1, kind: output, shape index: {}]  }
   0x1   :  { %7 = vsyncpa [#allocation4], 0  ;;  %s110_s6 = smov [#allocation2]  }
   0x2   :  { %s14_s7 = sshll.u32 %s110_s6, 4  ;;  %s15_s7 = int_to_ptr.vmem [resolvable:$true] %s14_s7 }
   0x3   :  { %s74_s8 = scalar_lea.vmem %s15_s7, 256  ;;  %p79_p1 = scmp.lt.s32.totalorder %s15_s7, %s15_s7 }
   0x4   :  { %p75_p0 = scmp.ne.s32.totalorder %s15_s7, %s74_s8  ;;  %p80_p2 = scmp.lt.s32.totalorder %s74_s8, %s74_s8 }
   0x6   :  { %p81_p3 = por %p80_p2, %p79_p1 }
   0x8   :  { %p82_p4 = pnand %p81_p3, %p75_p0 }
   0xa   :  { %85 = shalt.err (!%p82_p4)
}
   0xb   :  { %17 = dma.hbm_to_vmem [thread:$0]  %s128_s0, 256, %s15_s7, [#allocation3]  }
   0xc   :  { %106 = dma.done.wait [#allocation3], 256  }
   0xd   :  { %107 = vsyncadd [#allocation3], 4294967040  ;;  %v21_v0 = vld [vmem:[#allocation2] sm:$0xff]  ;;  %v22_v1 = vld [vmem:[#allocation2 + $0x8] sm:$0xff]  ;;  %s111_s11 = smov [#allocation5]  }
   0xe   :  { %v54_v2 = vmul.f32 -1.442695, %v21_v0  ;;  %v55_v3 = vmul.f32 -1.442695, %v22_v1  ;;  %s45_s12 = sshll.u32 %s111_s11, 4  ;;  %s46_s12 = int_to_ptr.vmem [resolvable:$true] %s45_s12 }
   0xf   :  { %s86_s0 = scalar_lea.vmem %s46_s12, 256  ;;  %p91_p6 = scmp.lt.s32.totalorder %s46_s12, %s46_s12 }
  0x10   :  { %58 = vpow2.f32 %v54_v2  ;;  %p87_p5 = scmp.ne.s32.totalorder %s46_s12, %s86_s0  ;;  %p92_p7 = scmp.lt.s32.totalorder %s86_s0, %s86_s0 }
  0x11   :  { %60 = vpow2.f32 %v55_v3 }
  0x12   :  { %p93_p8 = por %p92_p7, %p91_p6 }
  0x14   :  { %p94_p9 = pnand %p93_p8, %p87_p5 }
  0x1d   :  { %v59_v4 = vpop.eup %58 }
  0x1e   :  { %v61_v5 = vpop.eup %60  ;;  %v29_v6 = vadd.f32 1.0, %v59_v4 }
  0x1f   :  { %v30_v7 = vadd.f32 1.0, %v61_v5 }
  0x20   :  { %62 = vrcp.f32 %v29_v6 }
  0x21   :  { %64 = vrcp.f32 %v30_v7 }
  0x2d   :  { %v63_v8 = vpop.eup %62 }
  0x2e   :  { %v65_v9 = vpop.eup %64  ;;  %v35_v10 = vmul.f32 %v63_v8, %v21_v0 }
  0x2f   :  { %v36_v11 = vmul.f32 %v65_v9, %v22_v1 }
  0x30   :  { %37 = vst [vmem:[#allocation5] sm:$0xff] %v35_v10 }
  0x31   :  { %38 = vst [vmem:[#allocation5 + $0x8] sm:$0xff] %v36_v11 }
  0x32   :  { %97 = shalt.err (!%p94_p9)
}
  0x33   :  { %48 = dma.vmem_to_hbm [thread:$0]  %s46_s12, 256, %s129_s1, [#allocation4]  }
  0x34   :  { %108 = dma.done.wait [#allocation4], 256  }
  0x35   :  { %109 = vsyncadd [#allocation4], 4294967040 }
  0x36   :  { %52 = vsyncpa [#allocation3], 1 }
  0x37   :  { %53 = vsyncpa [#allocation4], 1 }

</bundles_post_ra>
